<compile_context>
chip_gen: v7x
topology: tpu7x:2x2x1
jax: 0.10.0
libtpu: 0.0.40
codegen_flags: <defaults>
</compile_context>

<pallas_src>
import math

import numpy as np
import jax
import jax.numpy as jnp
from jax.experimental import pallas as pl
from jax.experimental.pallas import tpu as pltpu

LANE = 128     # lane width of a vreg (last dim)
SUBLANE = 8    # sublane count of a vreg (second-to-last dim, f32)


def _round_up(x: int, m: int) -> int:
    return ((x + m - 1) // m) * m


def _vmem_capacity_bytes() -> int:
    try:
        return int(pltpu.get_tpu_info().vmem_capacity_bytes)
    except Exception:
        return 128 * 1024 * 1024  # conservative: v5e/v6e size; limits are clamped anyway


# --------------------------------------------------------------------------
# Kernels
# --------------------------------------------------------------------------
def make_fused_mlp_kernel(n_layers: int, compute_dtype):
    """Fused kernel. Refs: (x_ref, w0, b0, w1, b1, ..., o_ref)."""

    def kernel(*refs):
        x_ref, *wb_refs, o_ref = refs
        # No up-front f32 cast: the MXU input is bf16 either way, so feed the
        # first matmul straight from the input tile (saves a VPU cast/step).
        h = x_ref[...]
        for l in range(n_layers):
            w = wb_refs[2 * l][...]                 # (in_pad, out_pad) bf16 resident
            b = wb_refs[2 * l + 1][...]             # (1, out_pad) f32 resident
            y = jnp.dot(h.astype(compute_dtype), w,
                        preferred_element_type=jnp.float32)
            y = y + b                               # f32 epilogue
            if l < n_layers - 1:
                y = jnp.maximum(y, 0.0)             # ReLU on all but last layer
            h = y
        o_ref[...] = h.astype(o_ref.dtype)

    return kernel


def _make_linear_kernel(apply_relu: bool):
    """Per-layer tiled matmul + bias (+ReLU) for the large-model fallback."""

    def kernel(x_ref, w_ref, b_ref, o_ref, acc_ref):
        @pl.when(pl.program_id(2) == 0)
        def _init():
            acc_ref[...] = jnp.zeros_like(acc_ref)

        acc_ref[...] += jnp.dot(x_ref[...], w_ref[...],
                                preferred_element_type=jnp.float32)

        @pl.when(pl.program_id(2) == pl.num_programs(2) - 1)
        def _finalize():
            y = acc_ref[...] + b_ref[...]
            if apply_relu:
                y = jnp.maximum(y, 0.0)
            o_ref[...] = y.astype(o_ref.dtype)

    return kernel


# --------------------------------------------------------------------------
# Params
# --------------------------------------------------------------------------
def init_mlp_params(key, input_dim, hidden_layer_dims, output_dim):
    """Deterministic init mirroring nn.Linear shapes (Kaiming-uniform-like)."""
    layer_dims = (input_dim,) + tuple(hidden_layer_dims) + (output_dim,)
    params = []
    for in_dim, out_dim in zip(layer_dims[:-1], layer_dims[1:]):
        key, kw, kb = jax.random.split(key, 3)
        bound = 1.0 / math.sqrt(in_dim)
        # Stored as (in_dim, out_dim): transpose of PyTorch's (out_dim, in_dim).
        w = jax.random.uniform(kw, (in_dim, out_dim), jnp.float32, -bound, bound)
        b = jax.random.uniform(kb, (1, out_dim), jnp.float32, -bound, bound)
        params.append((w, b))
    return params


def prepare_params_for_kernel(params, compute_dtype=jnp.bfloat16):
    """Zero-pad every weight/bias to 128-multiples; cast weights to bf16."""
    # TODO(synk): on v7x, optionally store weights as fp8 (dequant scale folded
    # into the f32 epilogue) for 2x MXU throughput and half the resident VMEM.
    packed = []
    for w, b in params:
        in_d, out_d = w.shape
        in_p, out_p = _round_up(in_d, LANE), _round_up(out_d, LANE)
        w_p = jnp.zeros((in_p, out_p), compute_dtype).at[:in_d, :out_d].set(
            w.astype(compute_dtype))
        b_p = jnp.zeros((1, out_p), jnp.float32).at[:, :out_d].set(
            b.astype(jnp.float32))
        packed.append((w_p, b_p))
    return packed


# --------------------------------------------------------------------------
# Fast path: fully fused, weights VMEM-resident
# --------------------------------------------------------------------------
def _resident_spec(shape, single_buffer):
    """Constant-index (VMEM-resident) BlockSpec; single-buffered if possible."""
    idx_map = lambda i: (0,) * len(shape)
    if single_buffer:
        try:
            return pl.BlockSpec(shape, idx_map, pipeline_mode=pl.Buffered(1))
        except (TypeError, AttributeError):
            pass
    return pl.BlockSpec(shape, idx_map)


def _mlp_forward_fused(x, params, *, compute_dtype, out_dtype, batch_tile):
    B, in_dim = x.shape
    n_layers = len(params)
    out_dim = params[-1][0].shape[1]

    kparams = prepare_params_for_kernel(params, compute_dtype)
    in_pad = kparams[0][0].shape[0]
    out_pad = kparams[-1][0].shape[1]

    # Batch tile: sublane multiple (16 for bf16 inputs, 8 otherwise).
    sub = 16 if x.dtype == jnp.bfloat16 else SUBLANE
    TB = min(batch_tile, _round_up(B, sub))
    TB = _round_up(TB, sub)
    B_pad = _round_up(B, TB)
    # v7x has 2 TensorCores: prefer >= 2 grid steps on the 'parallel' axis.
    if B_pad // TB == 1 and TB >= 2 * sub:
        half = _round_up(TB // 2, sub)
        if half < TB and TB % half == 0:
            TB = half

    # Skip the wrapper pad copy when x is already tile-aligned (saves an HBM pass).
    if B_pad == B and in_pad == in_dim:
        x_p = x
    else:
        x_p = jnp.zeros((B_pad, in_pad), x.dtype).at[:B, :in_dim].set(x)

    # Advisory cost estimate (true, unpadded flops).
    flops = 2 * B * sum(w.shape[0] * w.shape[1] for w, _ in params)
    bytes_accessed = (
        x_p.size * x_p.dtype.itemsize
        + sum(w.size * w.dtype.itemsize + b.size * b.dtype.itemsize
              for w, b in kparams)
        + B_pad * out_pad * np.dtype(out_dtype).itemsize)

    # VMEM budget: single-buffered resident params + double-buffered x/out
    # tiles + n_layers-aware f32 intermediates, 2x headroom, clamped to 75%
    # of this chip's physical VMEM (v7x 64 MiB, v5e/v6e 128 MiB).
    cap = _vmem_capacity_bytes()
    resident = sum(w.size * w.dtype.itemsize + b.size * b.dtype.itemsize
                   for w, b in kparams)
    stream = (2 * TB * in_pad * x_p.dtype.itemsize
              + 2 * TB * out_pad * np.dtype(out_dtype).itemsize)
    interm = 4 * TB * (in_pad + sum(w.shape[1] for w, _ in kparams))
    vmem_limit = int(min(int(0.75 * cap),
                         max(8 * 1024 * 1024, 2 * (resident + stream + interm))))

    kernel = make_fused_mlp_kernel(n_layers, compute_dtype)

    def _run(single_buffer):
        in_specs = [pl.BlockSpec((TB, in_pad), lambda i: (i, 0))]
        flat_args = [x_p]
        for w_p, b_p in kparams:
            in_specs.append(_resident_spec(w_p.shape, single_buffer))
            in_specs.append(_resident_spec(b_p.shape, single_buffer))
            flat_args.extend([w_p, b_p])
        out_spec = pl.BlockSpec((TB, out_pad), lambda i: (i, 0))
        return pl.pallas_call(
            kernel,
            out_shape=jax.ShapeDtypeStruct((B_pad, out_pad), out_dtype),
            grid_spec=pltpu.PrefetchScalarGridSpec(
                num_scalar_prefetch=0,
                grid=(B_pad // TB,),
                in_specs=in_specs,
                out_specs=out_spec,
            ),
            compiler_params=pltpu.CompilerParams(
                dimension_semantics=("parallel",),
                vmem_limit_bytes=vmem_limit,
            ),
            cost_estimate=pl.CostEstimate(
                flops=flops, transcendentals=0, bytes_accessed=bytes_accessed),
        )(*flat_args)

    try:
        out_p = _run(True)
    except Exception:
        # TODO(synk): remove fallback once pl.Buffered(1) single-buffering is
        # universally supported for constant-index specs.
        out_p = _run(False)

    if B_pad == B and out_pad == out_dim:
        return out_p
    return out_p[:B, :out_dim]


# --------------------------------------------------------------------------
# Fallback path: per-layer tiled matmul (weights streamed, not resident)
# --------------------------------------------------------------------------
def _linear_pallas(x_p, w_p, b_p, *, apply_relu, out_dtype, tm, tn, tk):
    M, K = x_p.shape
    _, N = w_p.shape
    grid = (M // tm, N // tn, K // tk)

    cap = _vmem_capacity_bytes()
    tile_bytes = (2 * tm * tk * x_p.dtype.itemsize
                  + 2 * tk * tn * w_p.dtype.itemsize
                  + 2 * tn * 4
                  + 2 * tm * tn * np.dtype(out_dtype).itemsize
                  + tm * tn * 4)
    vmem_limit = int(min(int(0.75 * cap),
                         max(8 * 1024 * 1024, 2 * tile_bytes)))

    return pl.pallas_call(
        _make_linear_kernel(apply_relu),
        out_shape=jax.ShapeDtypeStruct((M, N), out_dtype),
        grid_spec=pltpu.PrefetchScalarGridSpec(
            num_scalar_prefetch=0,
            grid=grid,
            in_specs=[
                pl.BlockSpec((tm, tk), lambda i, j, k: (i, k)),
                pl.BlockSpec((tk, tn), lambda i, j, k: (k, j)),
                pl.BlockSpec((1, tn), lambda i, j, k: (0, j)),
            ],
            out_specs=pl.BlockSpec((tm, tn), lambda i, j, k: (i, j)),
            scratch_shapes=[pltpu.VMEM((tm, tn), jnp.float32)],
        ),
        compiler_params=pltpu.CompilerParams(
            dimension_semantics=("parallel", "parallel", "arbitrary"),
            vmem_limit_bytes=vmem_limit,
        ),
        cost_estimate=pl.CostEstimate(
            flops=2 * M * N * K, transcendentals=0,
            bytes_accessed=(M * K * x_p.dtype.itemsize
                            + K * N * w_p.dtype.itemsize
                            + N * 4
                            + M * N * np.dtype(out_dtype).itemsize)),
    )(x_p, w_p, b_p)


def _mlp_forward_layered(x, params, *, compute_dtype, out_dtype,
                         tm=256, tn=256, tk=512):
    B, in_dim = x.shape
    n_layers = len(params)
    out_dim = params[-1][0].shape[1]

    sub = 16 if np.dtype(compute_dtype) == np.dtype(jnp.bfloat16) else SUBLANE
    tm_eff = min(tm, _round_up(B, sub))
    tm_eff = _round_up(tm_eff, sub)
    M_pad = _round_up(B, tm_eff)

    h = x
    for idx, (w, b) in enumerate(params):
        last = (idx == n_layers - 1)
        in_d, out_d = w.shape

        tk_eff = min(tk, _round_up(in_d, LANE))
        K_pad = _round_up(in_d, tk_eff)
        tn_eff = min(tn, _round_up(out_d, LANE))
        N_pad = _round_up(out_d, tn_eff)

        w_p = jnp.zeros((K_pad, N_pad), compute_dtype).at[:in_d, :out_d].set(
            w.astype(compute_dtype))
        b_p = jnp.zeros((1, N_pad), jnp.float32).at[:, :out_d].set(
            b.astype(jnp.float32))

        act_dtype = compute_dtype   # intermediate activations stream as bf16
        if h.shape == (M_pad, K_pad) and h.dtype == np.dtype(act_dtype):
            h_p = h                 # already aligned: no pad copy
        else:
            rows = min(h.shape[0], M_pad)
            cols = min(h.shape[1], K_pad)
            h_p = jnp.zeros((M_pad, K_pad), act_dtype).at[:rows, :cols].set(
                h[:rows, :cols].astype(act_dtype))

        h = _linear_pallas(h_p, w_p, b_p,
                           apply_relu=not last,
                           out_dtype=(out_dtype if last else compute_dtype),
                           tm=tm_eff, tn=tn_eff, tk=tk_eff)

    if h.shape == (B, out_dim):
        return h
    return h[:B, :out_dim]


# --------------------------------------------------------------------------
# Dispatcher
# --------------------------------------------------------------------------
def mlp_forward_pallas(x, params, *, compute_dtype=jnp.bfloat16,
                       out_dtype=None, batch_tile=512, force_mode=None):
    """MLP forward (Linear+ReLU ... Linear), matching the PyTorch module.

    Fast path: single fused pallas_call with all padded weights VMEM-resident.
    Fallback ("layered"): per-layer tiled matmul kernels for weight sets that
    would not fit in VMEM (a hard requirement on v7x's 64 MiB).
    """
    if out_dtype is None:
        out_dtype = x.dtype

    cap = _vmem_capacity_bytes()
    resident = 0
    for w, _b in params:
        ip = _round_up(w.shape[0], LANE)
        op = _round_up(w.shape[1], LANE)
        resident += ip * op * np.dtype(compute_dtype).itemsize + op * 4

    mode = force_mode
    if mode is None:
        mode = "fused" if resident <= int(0.55 * cap) else "layered"

    if mode == "fused":
        return _mlp_forward_fused(x, params, compute_dtype=compute_dtype,
                                  out_dtype=out_dtype, batch_tile=batch_tile)
    return _mlp_forward_layered(x, params, compute_dtype=compute_dtype,
                                out_dtype=out_dtype)


# --------------------------------------------------------------------------
# References
# --------------------------------------------------------------------------
def mlp_reference_f32(x, params):
    """Pure-f32 semantic reference (matches the PyTorch module)."""
    n = len(params)
    h = x
    for idx, (w, b) in enumerate(params):
        h = h @ w + b
        if idx < n - 1:
            h = jnp.maximum(h, 0.0)
    return h


def mlp_reference_matched(x, params, compute_dtype=jnp.bfloat16):
    """Reference mirroring the kernel numerics (bf16 MXU inputs, f32 acc)."""
    n = len(params)
    h = x
    for idx, (w, b) in enumerate(params):
        y = jnp.dot(h.astype(compute_dtype), w.astype(compute_dtype),
                    preferred_element_type=jnp.float32)
        y = y + b
        if idx < n - 1:
            y = jnp.maximum(y, 0.0)
        h = y
    return h


# --------------------------------------------------------------------------
if __name__ == "__main__":
    key = jax.random.PRNGKey(0)
    batch = 8
    input_dim = 32
    hidden_layer_dims = [64, 32]
    output_dim = 16

    k_x, k_p = jax.random.split(key)
    x = jax.random.normal(k_x, (batch, input_dim), jnp.float32)
    params = init_mlp_params(k_p, input_dim, hidden_layer_dims, output_dim)

    ref_matched = mlp_reference_matched(x, params)
    ref_f32 = mlp_reference_f32(x, params)

    # Fast path: fused, VMEM-resident weights.
    out = jax.block_until_ready(mlp_forward_pallas(x, params))
    assert out.shape == (batch, output_dim)
    assert jnp.allclose(out, ref_matched, atol=1e-4, rtol=1e-4), \
        "fused kernel mismatch vs matched-precision reference"
    assert jnp.allclose(out, ref_f32, atol=1e-1, rtol=1e-1), \
        "fused kernel mismatch vs f32 reference"

    # Large-model fallback path (streamed weights), exercised explicitly so it
    # is also validated on-device at small shapes.
    out_l = jax.block_until_ready(
        mlp_forward_pallas(x, params, force_mode="layered"))
    assert out_l.shape == (batch, output_dim)
    assert jnp.allclose(out_l, ref_matched, atol=1e-4, rtol=1e-4), \
        "layered kernel mismatch vs matched-precision reference"

    print("KERNEL_OK")
</pallas_src>

<mosaic_0001>
module attributes {stable_mosaic.version = 11 : i64} {
  func.func @kernel(%arg0: i32, %arg1: memref<8x128xf32, #tpu.memory_space<vmem>>, %arg2: memref<128x128xbf16, #tpu.memory_space<vmem>>, %arg3: memref<1x128xf32, #tpu.memory_space<vmem>>, %arg4: memref<128x128xbf16, #tpu.memory_space<vmem>>, %arg5: memref<1x128xf32, #tpu.memory_space<vmem>>, %arg6: memref<128x128xbf16, #tpu.memory_space<vmem>>, %arg7: memref<1x128xf32, #tpu.memory_space<vmem>>, %arg8: memref<8x128xf32, #tpu.memory_space<vmem>>) attributes {dimension_semantics = [#tpu.dimension_semantics<parallel>], iteration_bounds = array<i64: 1>, scalar_prefetch = 0 : i64, scratch_operands = 0 : i64, tpu.core_type = #tpu.core_type<tc>, window_params = [{transform_indices = @transform_0, window_bounds = array<i64: 8, 128>}, {pipeline_mode = #tpu.pipeline_mode<synchronous>, transform_indices = @transform_1, window_bounds = array<i64: 128, 128>}, {pipeline_mode = #tpu.pipeline_mode<synchronous>, transform_indices = @transform_2, window_bounds = array<i64: 1, 128>}, {pipeline_mode = #tpu.pipeline_mode<synchronous>, transform_indices = @transform_3, window_bounds = array<i64: 128, 128>}, {pipeline_mode = #tpu.pipeline_mode<synchronous>, transform_indices = @transform_4, window_bounds = array<i64: 1, 128>}, {pipeline_mode = #tpu.pipeline_mode<synchronous>, transform_indices = @transform_5, window_bounds = array<i64: 128, 128>}, {pipeline_mode = #tpu.pipeline_mode<synchronous>, transform_indices = @transform_6, window_bounds = array<i64: 1, 128>}, {transform_indices = @transform_7, window_bounds = array<i64: 8, 128>}]} {
    %c0 = arith.constant 0 : index
    %c0_0 = arith.constant 0 : index
    %0 = vector.load %arg1[%c0, %c0_0] : memref<8x128xf32, #tpu.memory_space<vmem>>, vector<8x128xf32>
    %c0_1 = arith.constant 0 : index
    %c0_2 = arith.constant 0 : index
    %1 = vector.load %arg2[%c0_1, %c0_2] : memref<128x128xbf16, #tpu.memory_space<vmem>>, vector<128x128xbf16>
    %c0_3 = arith.constant 0 : index
    %c0_4 = arith.constant 0 : index
    %2 = vector.load %arg3[%c0_3, %c0_4] : memref<1x128xf32, #tpu.memory_space<vmem>>, vector<1x128xf32>
    %3 = arith.truncf %0 : vector<8x128xf32> to vector<8x128xbf16>
    %cst = arith.constant dense<0.000000e+00> : vector<8x128xf32>
    %4 = tpu.matmul %3, %1, %cst {dimension_numbers = #tpu.dot_dimension_numbers<[1], [0], [0], [1], [0, 0, 1, 1], [], []>} : vector<8x128xbf16>, vector<128x128xbf16>, vector<8x128xf32> -> vector<8x128xf32>
    %5 = vector.broadcast %2 : vector<1x128xf32> to vector<8x128xf32>
    %6 = arith.addf %4, %5 : vector<8x128xf32>
    %cst_5 = arith.constant 0.000000e+00 : f32
    %7 = vector.broadcast %cst_5 : f32 to vector<8x128xf32>
    %8 = arith.maximumf %6, %7 : vector<8x128xf32>
    %c0_6 = arith.constant 0 : index
    %c0_7 = arith.constant 0 : index
    %9 = vector.load %arg4[%c0_6, %c0_7] : memref<128x128xbf16, #tpu.memory_space<vmem>>, vector<128x128xbf16>
    %c0_8 = arith.constant 0 : index
    %c0_9 = arith.constant 0 : index
    %10 = vector.load %arg5[%c0_8, %c0_9] : memref<1x128xf32, #tpu.memory_space<vmem>>, vector<1x128xf32>
    %11 = arith.truncf %8 : vector<8x128xf32> to vector<8x128xbf16>
    %cst_10 = arith.constant dense<0.000000e+00> : vector<8x128xf32>
    %12 = tpu.matmul %11, %9, %cst_10 {dimension_numbers = #tpu.dot_dimension_numbers<[1], [0], [0], [1], [0, 0, 1, 1], [], []>} : vector<8x128xbf16>, vector<128x128xbf16>, vector<8x128xf32> -> vector<8x128xf32>
    %13 = vector.broadcast %10 : vector<1x128xf32> to vector<8x128xf32>
    %14 = arith.addf %12, %13 : vector<8x128xf32>
    %cst_11 = arith.constant 0.000000e+00 : f32
    %15 = vector.broadcast %cst_11 : f32 to vector<8x128xf32>
    %16 = arith.maximumf %14, %15 : vector<8x128xf32>
    %c0_12 = arith.constant 0 : index
    %c0_13 = arith.constant 0 : index
    %17 = vector.load %arg6[%c0_12, %c0_13] : memref<128x128xbf16, #tpu.memory_space<vmem>>, vector<128x128xbf16>
    %c0_14 = arith.constant 0 : index
    %c0_15 = arith.constant 0 : index
    %18 = vector.load %arg7[%c0_14, %c0_15] : memref<1x128xf32, #tpu.memory_space<vmem>>, vector<1x128xf32>
    %19 = arith.truncf %16 : vector<8x128xf32> to vector<8x128xbf16>
    %cst_16 = arith.constant dense<0.000000e+00> : vector<8x128xf32>
    %20 = tpu.matmul %19, %17, %cst_16 {dimension_numbers = #tpu.dot_dimension_numbers<[1], [0], [0], [1], [0, 0, 1, 1], [], []>} : vector<8x128xbf16>, vector<128x128xbf16>, vector<8x128xf32> -> vector<8x128xf32>
    %21 = vector.broadcast %18 : vector<1x128xf32> to vector<8x128xf32>
    %22 = arith.addf %20, %21 : vector<8x128xf32>
    %c0_17 = arith.constant 0 : index
    %c0_18 = arith.constant 0 : index
    %23 = vector.load %arg8[%c0_17, %c0_18] : memref<8x128xf32, #tpu.memory_space<vmem>>, vector<8x128xf32>
    tpu.vector_store %arg8[%c0_17, %c0_18], %22 {strides = array<i32>} : memref<8x128xf32, #tpu.memory_space<vmem>>, vector<8x128xf32>,
    return
  }
  func.func @transform_0(%arg0: i32) -> (i32, i32) {
    %c0_i32 = arith.constant 0 : i32
    %c0_i32_0 = arith.constant 0 : i32
    return %arg0, %c0_i32 : i32, i32
  }
  func.func @transform_1(%arg0: i32) -> (i32, i32) {
    %c0_i32 = arith.constant 0 : i32
    %c0_i32_0 = arith.constant 0 : i32
    %c0_i32_1 = arith.constant 0 : i32
    return %c0_i32, %c0_i32_0 : i32, i32
  }
  func.func @transform_2(%arg0: i32) -> (i32, i32) {
    %c0_i32 = arith.constant 0 : i32
    %c0_i32_0 = arith.constant 0 : i32
    %c0_i32_1 = arith.constant 0 : i32
    return %c0_i32, %c0_i32_0 : i32, i32
  }
  func.func @transform_3(%arg0: i32) -> (i32, i32) {
    %c0_i32 = arith.constant 0 : i32
    %c0_i32_0 = arith.constant 0 : i32
    %c0_i32_1 = arith.constant 0 : i32
    return %c0_i32, %c0_i32_0 : i32, i32
  }
  func.func @transform_4(%arg0: i32) -> (i32, i32) {
    %c0_i32 = arith.constant 0 : i32
    %c0_i32_0 = arith.constant 0 : i32
    %c0_i32_1 = arith.constant 0 : i32
    return %c0_i32, %c0_i32_0 : i32, i32
  }
  func.func @transform_5(%arg0: i32) -> (i32, i32) {
    %c0_i32 = arith.constant 0 : i32
    %c0_i32_0 = arith.constant 0 : i32
    %c0_i32_1 = arith.constant 0 : i32
    return %c0_i32, %c0_i32_0 : i32, i32
  }
  func.func @transform_6(%arg0: i32) -> (i32, i32) {
    %c0_i32 = arith.constant 0 : i32
    %c0_i32_0 = arith.constant 0 : i32
    %c0_i32_1 = arith.constant 0 : i32
    return %c0_i32, %c0_i32_0 : i32, i32
  }
  func.func @transform_7(%arg0: i32) -> (i32, i32) {
    %c0_i32 = arith.constant 0 : i32
    %c0_i32_0 = arith.constant 0 : i32
    return %arg0, %c0_i32 : i32, i32
  }
}

module attributes {stable_mosaic.version = 11 : i64} {
  func.func @kernel(%arg0: i32, %arg1: memref<8x128xf32, #tpu.memory_space<vmem>>, %arg2: memref<128x128xbf16, #tpu.memory_space<vmem>>, %arg3: memref<1x128xf32, #tpu.memory_space<vmem>>, %arg4: memref<128x128xbf16, #tpu.memory_space<vmem>>, %arg5: memref<1x128xf32, #tpu.memory_space<vmem>>, %arg6: memref<128x128xbf16, #tpu.memory_space<vmem>>, %arg7: memref<1x128xf32, #tpu.memory_space<vmem>>, %arg8: memref<8x128xf32, #tpu.memory_space<vmem>>) attributes {dimension_semantics = [#tpu.dimension_semantics<parallel>], iteration_bounds = array<i64: 1>, scalar_prefetch = 0 : i64, scratch_operands = 0 : i64, tpu.core_type = #tpu.core_type<tc>, window_params = [{transform_indices = @transform_0, window_bounds = array<i64: 8, 128>}, {pipeline_mode = #tpu.pipeline_mode<synchronous>, transform_indices = @transform_1, window_bounds = array<i64: 128, 128>}, {pipeline_mode = #tpu.pipeline_mode<synchronous>, transform_indices = @transform_2, window_bounds = array<i64: 1, 128>}, {pipeline_mode = #tpu.pipeline_mode<synchronous>, transform_indices = @transform_3, window_bounds = array<i64: 128, 128>}, {pipeline_mode = #tpu.pipeline_mode<synchronous>, transform_indices = @transform_4, window_bounds = array<i64: 1, 128>}, {pipeline_mode = #tpu.pipeline_mode<synchronous>, transform_indices = @transform_5, window_bounds = array<i64: 128, 128>}, {pipeline_mode = #tpu.pipeline_mode<synchronous>, transform_indices = @transform_6, window_bounds = array<i64: 1, 128>}, {transform_indices = @transform_7, window_bounds = array<i64: 8, 128>}]} {
    %c0 = arith.constant 0 : index
    %c0_0 = arith.constant 0 : index
    %0 = vector.load %arg1[%c0, %c0_0] : memref<8x128xf32, #tpu.memory_space<vmem>>, vector<8x128xf32>
    %c0_1 = arith.constant 0 : index
    %c0_2 = arith.constant 0 : index
    %1 = vector.load %arg2[%c0_1, %c0_2] : memref<128x128xbf16, #tpu.memory_space<vmem>>, vector<128x128xbf16>
    %c0_3 = arith.constant 0 : index
    %c0_4 = arith.constant 0 : index
    %2 = vector.load %arg3[%c0_3, %c0_4] : memref<1x128xf32, #tpu.memory_space<vmem>>, vector<1x128xf32>
    %3 = arith.truncf %0 : vector<8x128xf32> to vector<8x128xbf16>
    %cst = arith.constant dense<0.000000e+00> : vector<8x128xf32>
    %4 = tpu.matmul %3, %1, %cst {dimension_numbers = #tpu.dot_dimension_numbers<[1], [0], [0], [1], [0, 0, 1, 1], [], []>} : vector<8x128xbf16>, vector<128x128xbf16>, vector<8x128xf32> -> vector<8x128xf32>
    %5 = vector.broadcast %2 : vector<1x128xf32> to vector<8x128xf32>
    %6 = arith.addf %4, %5 : vector<8x128xf32>
    %cst_5 = arith.constant 0.000000e+00 : f32
    %7 = vector.broadcast %cst_5 : f32 to vector<8x128xf32>
    %8 = arith.maximumf %6, %7 : vector<8x128xf32>
    %c0_6 = arith.constant 0 : index
    %c0_7 = arith.constant 0 : index
    %9 = vector.load %arg4[%c0_6, %c0_7] : memref<128x128xbf16, #tpu.memory_space<vmem>>, vector<128x128xbf16>
    %c0_8 = arith.constant 0 : index
    %c0_9 = arith.constant 0 : index
    %10 = vector.load %arg5[%c0_8, %c0_9] : memref<1x128xf32, #tpu.memory_space<vmem>>, vector<1x128xf32>
    %11 = arith.truncf %8 : vector<8x128xf32> to vector<8x128xbf16>
    %cst_10 = arith.constant dense<0.000000e+00> : vector<8x128xf32>
    %12 = tpu.matmul %11, %9, %cst_10 {dimension_numbers = #tpu.dot_dimension_numbers<[1], [0], [0], [1], [0, 0, 1, 1], [], []>} : vector<8x128xbf16>, vector<128x128xbf16>, vector<8x128xf32> -> vector<8x128xf32>
    %13 = vector.broadcast %10 : vector<1x128xf32> to vector<8x128xf32>
    %14 = arith.addf %12, %13 : vector<8x128xf32>
    %cst_11 = arith.constant 0.000000e+00 : f32
    %15 = vector.broadcast %cst_11 : f32 to vector<8x128xf32>
    %16 = arith.maximumf %14, %15 : vector<8x128xf32>
    %c0_12 = arith.constant 0 : index
    %c0_13 = arith.constant 0 : index
    %17 = vector.load %arg6[%c0_12, %c0_13] : memref<128x128xbf16, #tpu.memory_space<vmem>>, vector<128x128xbf16>
    %c0_14 = arith.constant 0 : index
    %c0_15 = arith.constant 0 : index
    %18 = vector.load %arg7[%c0_14, %c0_15] : memref<1x128xf32, #tpu.memory_space<vmem>>, vector<1x128xf32>
    %19 = arith.truncf %16 : vector<8x128xf32> to vector<8x128xbf16>
    %cst_16 = arith.constant dense<0.000000e+00> : vector<8x128xf32>
    %20 = tpu.matmul %19, %17, %cst_16 {dimension_numbers = #tpu.dot_dimension_numbers<[1], [0], [0], [1], [0, 0, 1, 1], [], []>} : vector<8x128xbf16>, vector<128x128xbf16>, vector<8x128xf32> -> vector<8x128xf32>
    %21 = vector.broadcast %18 : vector<1x128xf32> to vector<8x128xf32>
    %22 = arith.addf %20, %21 : vector<8x128xf32>
    %c0_17 = arith.constant 0 : index
    %c0_18 = arith.constant 0 : index
    %23 = vector.load %arg8[%c0_17, %c0_18] : memref<8x128xf32, #tpu.memory_space<vmem>>, vector<8x128xf32>
    tpu.vector_store %arg8[%c0_17, %c0_18], %22 {strides = array<i32>} : memref<8x128xf32, #tpu.memory_space<vmem>>, vector<8x128xf32>,
    return
  }
  func.func @transform_0(%arg0: i32) -> (i32, i32) {
    %c0_i32 = arith.constant 0 : i32
    %c0_i32_0 = arith.constant 0 : i32
    return %arg0, %c0_i32 : i32, i32
  }
  func.func @transform_1(%arg0: i32) -> (i32, i32) {
    %c0_i32 = arith.constant 0 : i32
    %c0_i32_0 = arith.constant 0 : i32
    %c0_i32_1 = arith.constant 0 : i32
    return %c0_i32, %c0_i32_0 : i32, i32
  }
  func.func @transform_2(%arg0: i32) -> (i32, i32) {
    %c0_i32 = arith.constant 0 : i32
    %c0_i32_0 = arith.constant 0 : i32
    %c0_i32_1 = arith.constant 0 : i32
    return %c0_i32, %c0_i32_0 : i32, i32
  }
  func.func @transform_3(%arg0: i32) -> (i32, i32) {
    %c0_i32 = arith.constant 0 : i32
    %c0_i32_0 = arith.constant 0 : i32
    %c0_i32_1 = arith.constant 0 : i32
    return %c0_i32, %c0_i32_0 : i32, i32
  }
  func.func @transform_4(%arg0: i32) -> (i32, i32) {
    %c0_i32 = arith.constant 0 : i32
    %c0_i32_0 = arith.constant 0 : i32
    %c0_i32_1 = arith.constant 0 : i32
    return %c0_i32, %c0_i32_0 : i32, i32
  }
  func.func @transform_5(%arg0: i32) -> (i32, i32) {
    %c0_i32 = arith.constant 0 : i32
    %c0_i32_0 = arith.constant 0 : i32
    %c0_i32_1 = arith.constant 0 : i32
    return %c0_i32, %c0_i32_0 : i32, i32
  }
  func.func @transform_6(%arg0: i32) -> (i32, i32) {
    %c0_i32 = arith.constant 0 : i32
    %c0_i32_0 = arith.constant 0 : i32
    %c0_i32_1 = arith.constant 0 : i32
    return %c0_i32, %c0_i32_0 : i32, i32
  }
  func.func @transform_7(%arg0: i32) -> (i32, i32) {
    %c0_i32 = arith.constant 0 : i32
    %c0_i32_0 = arith.constant 0 : i32
    return %arg0, %c0_i32 : i32, i32
  }
}

</mosaic_0001>

<bundles_post_ra>
// kernel: tpu_custom_call.1
= control target key start
LH: loop header
LB: loop body
LE: loop exit
PB: predicated region body
PF: predicated region fallthrough
CT: control target
= control target key end

     0   :  { %12 = vsyncpa [#allocation3], 0  ;;  %s860_s0 = inlined_call_operand.hbm [shape: f32[8,128], index: 0, kind: input, shape index: {}]   ;;  %s861_s1 = inlined_call_operand.hbm [shape: bf16[128,128], index: 1, kind: input, shape index: {}]   ;;  %s862_s2 = inlined_call_operand.vmem [shape: f32[1,128], index: 2, kind: input, shape index: {}]   ;;  %s863_s3 = inlined_call_operand.hbm [shape: bf16[128,128], index: 3, kind: input, shape index: {}]   ;;  %s864_s4 = inlined_call_operand.vmem [shape: f32[1,128], index: 4, kind: input, shape index: {}]   ;;  %s865_s5 = inlined_call_operand.hbm [shape: bf16[128,128], index: 5, kind: input, shape index: {}]   ;;  %s866_s6 = inlined_call_operand.vmem [shape: f32[1,128], index: 6, kind: input, shape index: {}]   ;;  %s867_s7 = inlined_call_operand.hbm [shape: f32[8,128], index: 7, kind: output, shape index: {}]  }
   0x1   :  { %13 = vsyncpa [#allocation6], 0 }
   0x2   :  { %14 = vsyncpa [#allocation9], 0 }
   0x3   :  { %15 = vsyncpa [#allocation4], 0  ;;  %s703_s24 = smov [#allocation5]   ;;  %s585_s28 = scalar_lea.hbm %s861_s1, 1024 }
   0x4   :  { %s31_s25 = sshll.u32 %s703_s24, 4  ;;  %p586_p0 = scmp.ne.s32.totalorder %s861_s1, %s585_s28  ;;  %s32_s25 = int_to_ptr.vmem [resolvable:$true] %s31_s25 }
   0x5   :  { %p589_p1 = scmp.lt.u32.totalorder %s585_s28, %s861_s1 }
   0x7   :  { %p591_p2 = pnand %p589_p1, %p586_p0 }
   0x9   :  { %594 = shalt.err (!%p591_p2)
}
   0xa   :  { %s595_s10 = scalar_lea.vmem %s32_s25, 1024  ;;  %p600_p4 = scmp.lt.s32.totalorder %s32_s25, %s32_s25 }
   0xb   :  { %p596_p3 = scmp.ne.s32.totalorder %s32_s25, %s595_s10  ;;  %p601_p5 = scmp.lt.s32.totalorder %s595_s10, %s595_s10 }
   0xd   :  { %p602_p6 = por %p601_p5, %p600_p4 }
   0xf   :  { %p603_p7 = pnand %p602_p6, %p596_p3 }
  0x11   :  { %606 = shalt.err (!%p603_p7)
}
  0x12   :  { %s704_s11 = smov 64   ;;  %s705_s12 = smov 4  }
  0x13   :  { %37 = dma.hbm_to_vmem [thread:$0]  %s861_s1, 1024, %s32_s25, [#allocation6], %s704_s11, %s704_s11, %s705_s12  }
  0x14   :  { %s706_s15 = smov [#allocation2]   ;;  %s707_s17 = smov [#allocation7]  }
  0x15   :  { %s22_s16 = sshll.u32 %s706_s15, 4  ;;  %s45_s18 = sshll.u32 %s707_s17, 4  ;;  %s23_s16 = int_to_ptr.vmem [resolvable:$true] %s22_s16  ;;  %s46_s18 = int_to_ptr.vmem [resolvable:$true] %s45_s18 }
  0x16   :  { %s607_s21 = scalar_lea.hbm %s860_s0, 128 }
  0x17   :  { %p608_p8 = scmp.ne.s32.totalorder %s860_s0, %s607_s21  ;;  %p611_p9 = scmp.lt.u32.totalorder %s607_s21, %s860_s0 }
  0x19   :  { %p613_p10 = pnand %p611_p9, %p608_p8 }
  0x1b   :  { %616 = shalt.err (!%p613_p10)
}
  0x1c   :  { %s617_s1 = scalar_lea.vmem %s23_s16, 128  ;;  %p622_p12 = scmp.lt.s32.totalorder %s23_s16, %s23_s16 }
  0x1d   :  { %p618_p11 = scmp.ne.s32.totalorder %s23_s16, %s617_s1  ;;  %p623_p13 = scmp.lt.s32.totalorder %s617_s1, %s617_s1 }
  0x1f   :  { %p624_p0 = por %p623_p13, %p622_p12 }
  0x21   :  { %p625_p1 = pnand %p624_p0, %p618_p11 }
  0x23   :  { %628 = shalt.err (!%p625_p1)
}
  0x24   :  { %25 = dma.hbm_to_vmem [thread:$0]  %s860_s0, 128, %s23_s16, [#allocation3]  }
  0x25   :  { %s629_s30 = scalar_lea.hbm %s863_s3, 1024 }
  0x26   :  { %p630_p2 = scmp.ne.s32.totalorder %s863_s3, %s629_s30  ;;  %p633_p3 = scmp.lt.u32.totalorder %s629_s30, %s863_s3 }
  0x28   :  { %p635_p4 = pnand %p633_p3, %p630_p2 }
  0x2a   :  { %638 = shalt.err (!%p635_p4)
}
  0x2b   :  { %s639_s14 = scalar_lea.vmem %s46_s18, 1024  ;;  %p644_p6 = scmp.lt.s32.totalorder %s46_s18, %s46_s18 }
  0x2c   :  { %p640_p5 = scmp.ne.s32.totalorder %s46_s18, %s639_s14  ;;  %p645_p7 = scmp.lt.s32.totalorder %s639_s14, %s639_s14 }
  0x2e   :  { %p646_p8 = por %p645_p7, %p644_p6 }
  0x30   :  { %p647_p9 = pnand %p646_p8, %p640_p5 }
  0x32   :  { %650 = shalt.err (!%p647_p9)
}
  0x33   :  { %51 = dma.hbm_to_vmem [thread:$0]  %s863_s3, 1024, %s46_s18, [#allocation6], %s704_s11, %s704_s11, %s705_s12  }
  0x34   :  { %s708_s16 = smov [#allocation8]   ;;  %s651_s21 = scalar_lea.hbm %s865_s5, 1024 }
  0x35   :  { %s59_s17 = sshll.u32 %s708_s16, 4  ;;  %p652_p10 = scmp.ne.s32.totalorder %s865_s5, %s651_s21  ;;  %s60_s17 = int_to_ptr.vmem [resolvable:$true] %s59_s17 }
  0x36   :  { %p655_p11 = scmp.lt.u32.totalorder %s651_s21, %s865_s5 }
  0x38   :  { %p657_p12 = pnand %p655_p11, %p652_p10 }
  0x3a   :  { %660 = shalt.err (!%p657_p12)
}
  0x3b   :  { %s661_s1 = scalar_lea.vmem %s60_s17, 1024  ;;  %p666_p0 = scmp.lt.s32.totalorder %s60_s17, %s60_s17 }
  0x3c   :  { %p662_p13 = scmp.ne.s32.totalorder %s60_s17, %s661_s1  ;;  %p667_p1 = scmp.lt.s32.totalorder %s661_s1, %s661_s1 }
  0x3e   :  { %p668_p2 = por %p667_p1, %p666_p0 }
  0x40   :  { %p669_p3 = pnand %p668_p2, %p662_p13 }
  0x42   :  { %672 = shalt.err (!%p669_p3)
}
  0x43   :  { %65 = dma.hbm_to_vmem [thread:$0]  %s865_s5, 1024, %s60_s17, [#allocation9], %s704_s11, %s704_s11, %s705_s12  }
  0x44   :  { %695 = dma.done.wait [#allocation3], 128  }
  0x45   :  { %696 = vsyncadd [#allocation3], 4294967168 }
  0x46   :  { %697 = dma.done.wait [#allocation6], 2048  }
  0x47   :  { %698 = vsyncadd [#allocation6], 4294965248 }
  0x48   :  { %699 = dma.done.wait [#allocation9], 1024  }
  0x49   :  { %700 = vsyncadd [#allocation9], 4294966272  ;;  %v709_v0 = vmov 0.0   ;;  %vm710_vm0 = vmmov 0   ;;  %v561_v1 = vld [vmem:[#allocation5] sm:$0xff]   ;;  %v562_v2 = vld [vmem:[#allocation5 + $0x8] sm:$0xff]  }
  0x4a   :  { %492 = vmatprep.subr.bf16.mxu0 %v709_v0  ;;  %508 = vmatprep.mubr.msk.bf16.mxu0 %vm710_vm0, %v709_v0  ;;  %v563_v3 = vld [vmem:[#allocation5 + $0x10] sm:$0xff]   ;;  %v569_v4 = vld [vmem:[#allocation7] sm:$0xff]   ;;  %v564_v5 = vld [vmem:[#allocation5 + $0x18] sm:$0xff]   ;;  %s711_s28 = smov [#allocation10]  }
  0x4b   :  { %512 = vmatprep.subr.bf16.mxu1 %v709_v0  ;;  %528 = vmatprep.mubr.msk.bf16.mxu1 %vm710_vm0, %v709_v0  ;;  %v570_v6 = vld [vmem:[#allocation7 + $0x8] sm:$0xff]   ;;  %v565_v7 = vld [vmem:[#allocation5 + $0x20] sm:$0xff]   ;;  %v571_v8 = vld [vmem:[#allocation7 + $0x10] sm:$0xff]   ;;  %s427_s29 = sshll.u32 %s711_s28, 4  ;;  %s428_s29 = int_to_ptr.vmem [resolvable:$true] %s427_s29 }
  0x4c   :  { %493 = vmatpush3.bf16.msra.mxu0 %v561_v1  ;;  %513 = vmatpush3.bf16.msra.mxu1 %v569_v4  ;;  %v566_v9 = vld [vmem:[#allocation5 + $0x28] sm:$0xff]   ;;  %v572_v10 = vld [vmem:[#allocation7 + $0x18] sm:$0xff]   ;;  %v567_v11 = vld [vmem:[#allocation5 + $0x30] sm:$0xff]   ;;  %p678_p5 = scmp.lt.s32.totalorder %s428_s29, %s428_s29 }
  0x4d   :  { %494 = vmatprep.subr.bf16.mxu0 %v709_v0  ;;  %514 = vmatprep.subr.bf16.mxu1 %v709_v0  ;;  %v573_v12 = vld [vmem:[#allocation7 + $0x20] sm:$0xff]   ;;  %v568_v13 = vld [vmem:[#allocation5 + $0x38] sm:$0xff]   ;;  %v574_v15 = vld [vmem:[#allocation7 + $0x28] sm:$0xff]  }
  0x4e   :  { %v81_v14 = vld [vmem:[#allocation2] sm:$0xff]  ;;  %v575_v17 = vld [vmem:[#allocation7 + $0x30] sm:$0xff]   ;;  %v577_v19 = vld [vmem:[#allocation8] sm:$0xff]  }
  0x4f   :  { %v99_v16 = vpack.c.bf16 %v81_v14, %v81_v14  ;;  %v576_v18 = vld [vmem:[#allocation7 + $0x38] sm:$0xff]   ;;  %v578_v20 = vld [vmem:[#allocation8 + $0x8] sm:$0xff]   ;;  %v579_v21 = vld [vmem:[#allocation8 + $0x10] sm:$0xff]  }
  0x50   :  { %495 = vmatpush3.bf16.msra.mxu0 %v562_v2  ;;  %515 = vmatpush3.bf16.msra.mxu1 %v570_v6  ;;  %v580_v22 = vld [vmem:[#allocation8 + $0x18] sm:$0xff]   ;;  %v581_v23 = vld [vmem:[#allocation8 + $0x20] sm:$0xff]   ;;  %v582_v24 = vld [vmem:[#allocation8 + $0x28] sm:$0xff]  }
  0x51   :  { %496 = vmatprep.subr.bf16.mxu0 %v709_v0  ;;  %516 = vmatprep.subr.bf16.mxu1 %v709_v0  ;;  %v438_v25 = vld [vmem:[%s862_s2] ss:$0 sm:$0xff]  ;;  %v583_v33 = vld [vmem:[#allocation8 + $0x30] sm:$0xff]  }
  0x52   :  { %v584_v34 = vld [vmem:[#allocation8 + $0x38] sm:$0xff]  }
  0x53   :  { %v447_v35 = vld [vmem:[%s864_s4] ss:$0 sm:$0xff]  ;;  %s673_s4 = scalar_lea.vmem %s428_s29, 128 }
  0x54   :  { %497 = vmatpush3.bf16.msra.mxu0 %v563_v3  ;;  %517 = vmatpush3.bf16.msra.mxu1 %v571_v8  ;;  %v456_v43 = vld [vmem:[%s866_s6] ss:$0 sm:$0xff]  ;;  %p674_p4 = scmp.ne.s32.totalorder %s428_s29, %s673_s4  ;;  %p679_p6 = scmp.lt.s32.totalorder %s673_s4, %s673_s4 }
  0x55   :  { %498 = vmatprep.subr.bf16.mxu0 %v709_v0  ;;  %518 = vmatprep.subr.bf16.mxu1 %v709_v0 }
  0x56   :  { %p680_p7 = por %p679_p6, %p678_p5 }
  0x58   :  { %499 = vmatpush3.bf16.msra.mxu0 %v564_v5  ;;  %519 = vmatpush3.bf16.msra.mxu1 %v572_v10  ;;  %p681_p8 = pnand %p680_p7, %p674_p4 }
  0x59   :  { %500 = vmatprep.subr.bf16.mxu0 %v709_v0  ;;  %520 = vmatprep.subr.bf16.mxu1 %v709_v0 }
  0x5c   :  { %501 = vmatpush3.bf16.msra.mxu0 %v565_v7  ;;  %521 = vmatpush3.bf16.msra.mxu1 %v573_v12 }
  0x5d   :  { %502 = vmatprep.subr.bf16.mxu0 %v709_v0  ;;  %522 = vmatprep.subr.bf16.mxu1 %v709_v0 }
  0x60   :  { %503 = vmatpush3.bf16.msra.mxu0 %v566_v9  ;;  %523 = vmatpush3.bf16.msra.mxu1 %v574_v15 }
  0x61   :  { %504 = vmatprep.subr.bf16.mxu0 %v709_v0  ;;  %524 = vmatprep.subr.bf16.mxu1 %v709_v0 }
  0x64   :  { %505 = vmatpush3.bf16.msra.mxu0 %v567_v11  ;;  %525 = vmatpush3.bf16.msra.mxu1 %v575_v17 }
  0x65   :  { %506 = vmatprep.subr.bf16.mxu0 %v709_v0  ;;  %526 = vmatprep.subr.bf16.mxu1 %v709_v0 }
  0x68   :  { %507 = vmatpush3.bf16.msra.mxu0 %v568_v13  ;;  %527 = vmatpush3.bf16.msra.mxu1 %v576_v18 }
  0x69   :  { %532 = vmatprep.subr.bf16.mxu0 %v709_v0 }
  0x6b   :  { %509 = vmatmul.mubr.bf16.vlgmr.msra.gmra.mrb[0].mxu0 %v99_v16 }
  0x6c   :  { %548 = vmatprep.mubr.msk.bf16.mxu0 %vm710_vm0, %v709_v0  ;;  %533 = vmatpush3.bf16.msra.mxu0 %v577_v19 }
  0x6d   :  { %534 = vmatprep.subr.bf16.mxu0 %v709_v0 }
  0x70   :  { %535 = vmatpush3.bf16.msra.mxu0 %v578_v20 }
  0x71   :  { %536 = vmatprep.subr.bf16.mxu0 %v709_v0 }
  0x74   :  { %537 = vmatpush3.bf16.msra.mxu0 %v579_v21 }
  0x75   :  { %538 = vmatprep.subr.bf16.mxu0 %v709_v0 }
  0x78   :  { %539 = vmatpush3.bf16.msra.mxu0 %v580_v22 }
  0x79   :  { %540 = vmatprep.subr.bf16.mxu0 %v709_v0 }
  0x7c   :  { %541 = vmatpush3.bf16.msra.mxu0 %v581_v23 }
  0x7d   :  { %542 = vmatprep.subr.bf16.mxu0 %v709_v0 }
  0x80   :  { %543 = vmatpush3.bf16.msra.mxu0 %v582_v24 }
  0x81   :  { %544 = vmatprep.subr.bf16.mxu0 %v709_v0 }
  0x84   :  { %545 = vmatpush3.bf16.msra.mxu0 %v583_v33 }
  0x85   :  { %546 = vmatprep.subr.bf16.mxu0 %v709_v0 }
  0x88   :  { %547 = vmatpush3.bf16.msra.mxu0 %v584_v34 }
 0x13e   :  { %v188_v26 = vpop.f32.mrb[0].mxu0 }
 0x13f   :  { %v189_v27 = vadd.f32 %v438_v25, %v188_v26  ;;  %v510_v28 = vpop.f32.mrb[1].mxu0 }
 0x140   :  { %v191_v29 = vpop.f32.mrb[2].mxu0 }
 0x141   :  { %v194_v30 = vmax.f32 %v189_v27, 0.0  ;;  %v511_v31 = vpop.f32.mrb[3].mxu0 }
 0x143   :  { %v212_v32 = vpack.c.bf16 %v194_v30, %v194_v30 }
 0x145   :  { %529 = vmatmul.mubr.bf16.vlgmr.msra.gmra.mrb[0].mxu1 %v212_v32 }
 0x218   :  { %v301_v36 = vpop.f32.mrb[0].mxu1 }
 0x219   :  { %v302_v37 = vadd.f32 %v447_v35, %v301_v36  ;;  %v530_v38 = vpop.f32.mrb[1].mxu1 }
 0x21a   :  { %v304_v39 = vpop.f32.mrb[2].mxu1 }
 0x21b   :  { %v307_v40 = vmax.f32 %v302_v37, 0.0  ;;  %v531_v41 = vpop.f32.mrb[3].mxu1 }
 0x21d   :  { %v325_v42 = vpack.c.bf16 %v307_v40, %v307_v40 }
 0x21f   :  { %549 = vmatmul.mubr.bf16.vlgmr.msra.gmra.mrb[4].mxu0 %v325_v42 }
 0x2f2   :  { %v414_v44 = vpop.f32.mrb[4].mxu0 }
 0x2f3   :  { %v415_v45 = vadd.f32 %v456_v43, %v414_v44  ;;  %v550_v46 = vpop.f32.mrb[5].mxu0 }
 0x2f4   :  { %v417_v47 = vpop.f32.mrb[6].mxu0 }
 0x2f5   :  { %420 = vst [vmem:[#allocation10] sm:$0xff] %v415_v45  ;;  %v551_v48 = vpop.f32.mrb[7].mxu0 }
 0x2f6   :  { %684 = shalt.err (!%p681_p8)
}
 0x2f7   :  { %s685_s6 = scalar_lea.hbm %s867_s7, 128 }
 0x2f8   :  { %p686_p9 = scmp.ne.s32.totalorder %s867_s7, %s685_s6  ;;  %p689_p10 = scmp.lt.u32.totalorder %s685_s6, %s867_s7 }
 0x2fa   :  { %p691_p11 = pnand %p689_p10, %p686_p9 }
 0x2fc   :  { %694 = shalt.err (!%p691_p11)
}
 0x2fd   :  { %430 = dma.vmem_to_hbm [thread:$0]  %s428_s29, 128, %s867_s7, [#allocation4]  }
 0x2fe   :  { %701 = dma.done.wait [#allocation4], 128  }
 0x2ff   :  { %702 = vsyncadd [#allocation4], 4294967168 }
 0x300   :  { %434 = vsyncpa [#allocation3], 1 }
 0x301   :  { %435 = vsyncpa [#allocation6], 1 }
 0x302   :  { %436 = vsyncpa [#allocation9], 1 }
 0x303   :  { %437 = vsyncpa [#allocation4], 1 }

// kernel: tpu_custom_call.1
= control target key start
LH: loop header
LB: loop body
LE: loop exit
PB: predicated region body
PF: predicated region fallthrough
CT: control target
= control target key end

     0   :  { %12 = vsyncpa [#allocation3], 0  ;;  %s860_s0 = inlined_call_operand.hbm [shape: f32[8,128], index: 0, kind: input, shape index: {}]   ;;  %s861_s1 = inlined_call_operand.hbm [shape: bf16[128,128], index: 1, kind: input, shape index: {}]   ;;  %s862_s2 = inlined_call_operand.vmem [shape: f32[1,128], index: 2, kind: input, shape index: {}]   ;;  %s863_s3 = inlined_call_operand.hbm [shape: bf16[128,128], index: 3, kind: input, shape index: {}]   ;;  %s864_s4 = inlined_call_operand.vmem [shape: f32[1,128], index: 4, kind: input, shape index: {}]   ;;  %s865_s5 = inlined_call_operand.hbm [shape: bf16[128,128], index: 5, kind: input, shape index: {}]   ;;  %s866_s6 = inlined_call_operand.vmem [shape: f32[1,128], index: 6, kind: input, shape index: {}]   ;;  %s867_s7 = inlined_call_operand.hbm [shape: f32[8,128], index: 7, kind: output, shape index: {}]  }
   0x1   :  { %13 = vsyncpa [#allocation6], 0 }
   0x2   :  { %14 = vsyncpa [#allocation9], 0 }
   0x3   :  { %15 = vsyncpa [#allocation4], 0  ;;  %s703_s24 = smov [#allocation5]   ;;  %s585_s28 = scalar_lea.hbm %s861_s1, 1024 }
   0x4   :  { %s31_s25 = sshll.u32 %s703_s24, 4  ;;  %p586_p0 = scmp.ne.s32.totalorder %s861_s1, %s585_s28  ;;  %s32_s25 = int_to_ptr.vmem [resolvable:$true] %s31_s25 }
   0x5   :  { %p589_p1 = scmp.lt.u32.totalorder %s585_s28, %s861_s1 }
   0x7   :  { %p591_p2 = pnand %p589_p1, %p586_p0 }
   0x9   :  { %594 = shalt.err (!%p591_p2)
}
   0xa   :  { %s595_s10 = scalar_lea.vmem %s32_s25, 1024  ;;  %p600_p4 = scmp.lt.s32.totalorder %s32_s25, %s32_s25 }
   0xb   :  { %p596_p3 = scmp.ne.s32.totalorder %s32_s25, %s595_s10  ;;  %p601_p5 = scmp.lt.s32.totalorder %s595_s10, %s595_s10 }
   0xd   :  { %p602_p6 = por %p601_p5, %p600_p4 }
   0xf   :  { %p603_p7 = pnand %p602_p6, %p596_p3 }
  0x11   :  { %606 = shalt.err (!%p603_p7)
}
  0x12   :  { %s704_s11 = smov 64   ;;  %s705_s12 = smov 4  }
  0x13   :  { %37 = dma.hbm_to_vmem [thread:$0]  %s861_s1, 1024, %s32_s25, [#allocation6], %s704_s11, %s704_s11, %s705_s12  }
  0x14   :  { %s706_s15 = smov [#allocation2]   ;;  %s707_s17 = smov [#allocation7]  }
  0x15   :  { %s22_s16 = sshll.u32 %s706_s15, 4  ;;  %s45_s18 = sshll.u32 %s707_s17, 4  ;;  %s23_s16 = int_to_ptr.vmem [resolvable:$true] %s22_s16  ;;  %s46_s18 = int_to_ptr.vmem [resolvable:$true] %s45_s18 }
  0x16   :  { %s607_s21 = scalar_lea.hbm %s860_s0, 128 }
  0x17   :  { %p608_p8 = scmp.ne.s32.totalorder %s860_s0, %s607_s21  ;;  %p611_p9 = scmp.lt.u32.totalorder %s607_s21, %s860_s0 }
  0x19   :  { %p613_p10 = pnand %p611_p9, %p608_p8 }
  0x1b   :  { %616 = shalt.err (!%p613_p10)
}
  0x1c   :  { %s617_s1 = scalar_lea.vmem %s23_s16, 128  ;;  %p622_p12 = scmp.lt.s32.totalorder %s23_s16, %s23_s16 }
  0x1d   :  { %p618_p11 = scmp.ne.s32.totalorder %s23_s16, %s617_s1  ;;  %p623_p13 = scmp.lt.s32.totalorder %s617_s1, %s617_s1 }
  0x1f   :  { %p624_p0 = por %p623_p13, %p622_p12 }
  0x21   :  { %p625_p1 = pnand %p624_p0, %p618_p11 }
  0x23   :  { %628 = shalt.err (!%p625_p1)
}
  0x24   :  { %25 = dma.hbm_to_vmem [thread:$0]  %s860_s0, 128, %s23_s16, [#allocation3]  }
  0x25   :  { %s629_s30 = scalar_lea.hbm %s863_s3, 1024 }
  0x26   :  { %p630_p2 = scmp.ne.s32.totalorder %s863_s3, %s629_s30  ;;  %p633_p3 = scmp.lt.u32.totalorder %s629_s30, %s863_s3 }
  0x28   :  { %p635_p4 = pnand %p633_p3, %p630_p2 }
  0x2a   :  { %638 = shalt.err (!%p635_p4)
}
  0x2b   :  { %s639_s14 = scalar_lea.vmem %s46_s18, 1024  ;;  %p644_p6 = scmp.lt.s32.totalorder %s46_s18, %s46_s18 }
  0x2c   :  { %p640_p5 = scmp.ne.s32.totalorder %s46_s18, %s639_s14  ;;  %p645_p7 = scmp.lt.s32.totalorder %s639_s14, %s639_s14 }
  0x2e   :  { %p646_p8 = por %p645_p7, %p644_p6 }
  0x30   :  { %p647_p9 = pnand %p646_p8, %p640_p5 }
  0x32   :  { %650 = shalt.err (!%p647_p9)
}
  0x33   :  { %51 = dma.hbm_to_vmem [thread:$0]  %s863_s3, 1024, %s46_s18, [#allocation6], %s704_s11, %s704_s11, %s705_s12  }
  0x34   :  { %s708_s16 = smov [#allocation8]   ;;  %s651_s21 = scalar_lea.hbm %s865_s5, 1024 }
  0x35   :  { %s59_s17 = sshll.u32 %s708_s16, 4  ;;  %p652_p10 = scmp.ne.s32.totalorder %s865_s5, %s651_s21  ;;  %s60_s17 = int_to_ptr.vmem [resolvable:$true] %s59_s17 }
  0x36   :  { %p655_p11 = scmp.lt.u32.totalorder %s651_s21, %s865_s5 }
  0x38   :  { %p657_p12 = pnand %p655_p11, %p652_p10 }
  0x3a   :  { %660 = shalt.err (!%p657_p12)
}
  0x3b   :  { %s661_s1 = scalar_lea.vmem %s60_s17, 1024  ;;  %p666_p0 = scmp.lt.s32.totalorder %s60_s17, %s60_s17 }
  0x3c   :  { %p662_p13 = scmp.ne.s32.totalorder %s60_s17, %s661_s1  ;;  %p667_p1 = scmp.lt.s32.totalorder %s661_s1, %s661_s1 }
  0x3e   :  { %p668_p2 = por %p667_p1, %p666_p0 }
  0x40   :  { %p669_p3 = pnand %p668_p2, %p662_p13 }
  0x42   :  { %672 = shalt.err (!%p669_p3)
}
  0x43   :  { %65 = dma.hbm_to_vmem [thread:$0]  %s865_s5, 1024, %s60_s17, [#allocation9], %s704_s11, %s704_s11, %s705_s12  }
  0x44   :  { %695 = dma.done.wait [#allocation3], 128  }
  0x45   :  { %696 = vsyncadd [#allocation3], 4294967168 }
  0x46   :  { %697 = dma.done.wait [#allocation6], 2048  }
  0x47   :  { %698 = vsyncadd [#allocation6], 4294965248 }
  0x48   :  { %699 = dma.done.wait [#allocation9], 1024  }
  0x49   :  { %700 = vsyncadd [#allocation9], 4294966272  ;;  %v709_v0 = vmov 0.0   ;;  %vm710_vm0 = vmmov 0   ;;  %v561_v1 = vld [vmem:[#allocation5] sm:$0xff]   ;;  %v562_v2 = vld [vmem:[#allocation5 + $0x8] sm:$0xff]  }
  0x4a   :  { %492 = vmatprep.subr.bf16.mxu0 %v709_v0  ;;  %508 = vmatprep.mubr.msk.bf16.mxu0 %vm710_vm0, %v709_v0  ;;  %v563_v3 = vld [vmem:[#allocation5 + $0x10] sm:$0xff]   ;;  %v569_v4 = vld [vmem:[#allocation7] sm:$0xff]   ;;  %v564_v5 = vld [vmem:[#allocation5 + $0x18] sm:$0xff]   ;;  %s711_s28 = smov [#allocation10]  }
  0x4b   :  { %512 = vmatprep.subr.bf16.mxu1 %v709_v0  ;;  %528 = vmatprep.mubr.msk.bf16.mxu1 %vm710_vm0, %v709_v0  ;;  %v570_v6 = vld [vmem:[#allocation7 + $0x8] sm:$0xff]   ;;  %v565_v7 = vld [vmem:[#allocation5 + $0x20] sm:$0xff]   ;;  %v571_v8 = vld [vmem:[#allocation7 + $0x10] sm:$0xff]   ;;  %s427_s29 = sshll.u32 %s711_s28, 4  ;;  %s428_s29 = int_to_ptr.vmem [resolvable:$true] %s427_s29 }
  0x4c   :  { %493 = vmatpush3.bf16.msra.mxu0 %v561_v1  ;;  %513 = vmatpush3.bf16.msra.mxu1 %v569_v4  ;;  %v566_v9 = vld [vmem:[#allocation5 + $0x28] sm:$0xff]   ;;  %v572_v10 = vld [vmem:[#allocation7 + $0x18] sm:$0xff]   ;;  %v567_v11 = vld [vmem:[#allocation5 + $0x30] sm:$0xff]   ;;  %p678_p5 = scmp.lt.s32.totalorder %s428_s29, %s428_s29 }
  0x4d   :  { %494 = vmatprep.subr.bf16.mxu0 %v709_v0  ;;  %514 = vmatprep.subr.bf16.mxu1 %v709_v0  ;;  %v573_v12 = vld [vmem:[#allocation7 + $0x20] sm:$0xff]   ;;  %v568_v13 = vld [vmem:[#allocation5 + $0x38] sm:$0xff]   ;;  %v574_v15 = vld [vmem:[#allocation7 + $0x28] sm:$0xff]  }
  0x4e   :  { %v81_v14 = vld [vmem:[#allocation2] sm:$0xff]  ;;  %v575_v17 = vld [vmem:[#allocation7 + $0x30] sm:$0xff]   ;;  %v577_v19 = vld [vmem:[#allocation8] sm:$0xff]  }
  0x4f   :  { %v99_v16 = vpack.c.bf16 %v81_v14, %v81_v14  ;;  %v576_v18 = vld [vmem:[#allocation7 + $0x38] sm:$0xff]   ;;  %v578_v20 = vld [vmem:[#allocation8 + $0x8] sm:$0xff]   ;;  %v579_v21 = vld [vmem:[#allocation8 + $0x10] sm:$0xff]  }
  0x50   :  { %495 = vmatpush3.bf16.msra.mxu0 %v562_v2  ;;  %515 = vmatpush3.bf16.msra.mxu1 %v570_v6  ;;  %v580_v22 = vld [vmem:[#allocation8 + $0x18] sm:$0xff]   ;;  %v581_v23 = vld [vmem:[#allocation8 + $0x20] sm:$0xff]   ;;  %v582_v24 = vld [vmem:[#allocation8 + $0x28] sm:$0xff]  }
  0x51   :  { %496 = vmatprep.subr.bf16.mxu0 %v709_v0  ;;  %516 = vmatprep.subr.bf16.mxu1 %v709_v0  ;;  %v438_v25 = vld [vmem:[%s862_s2] ss:$0 sm:$0xff]  ;;  %v583_v33 = vld [vmem:[#allocation8 + $0x30] sm:$0xff]  }
  0x52   :  { %v584_v34 = vld [vmem:[#allocation8 + $0x38] sm:$0xff]  }
  0x53   :  { %v447_v35 = vld [vmem:[%s864_s4] ss:$0 sm:$0xff]  ;;  %s673_s4 = scalar_lea.vmem %s428_s29, 128 }
  0x54   :  { %497 = vmatpush3.bf16.msra.mxu0 %v563_v3  ;;  %517 = vmatpush3.bf16.msra.mxu1 %v571_v8  ;;  %v456_v43 = vld [vmem:[%s866_s6] ss:$0 sm:$0xff]  ;;  %p674_p4 = scmp.ne.s32.totalorder %s428_s29, %s673_s4  ;;  %p679_p6 = scmp.lt.s32.totalorder %s673_s4, %s673_s4 }
  0x55   :  { %498 = vmatprep.subr.bf16.mxu0 %v709_v0  ;;  %518 = vmatprep.subr.bf16.mxu1 %v709_v0 }
  0x56   :  { %p680_p7 = por %p679_p6, %p678_p5 }
  0x58   :  { %499 = vmatpush3.bf16.msra.mxu0 %v564_v5  ;;  %519 = vmatpush3.bf16.msra.mxu1 %v572_v10  ;;  %p681_p8 = pnand %p680_p7, %p674_p4 }
  0x59   :  { %500 = vmatprep.subr.bf16.mxu0 %v709_v0  ;;  %520 = vmatprep.subr.bf16.mxu1 %v709_v0 }
  0x5c   :  { %501 = vmatpush3.bf16.msra.mxu0 %v565_v7  ;;  %521 = vmatpush3.bf16.msra.mxu1 %v573_v12 }
  0x5d   :  { %502 = vmatprep.subr.bf16.mxu0 %v709_v0  ;;  %522 = vmatprep.subr.bf16.mxu1 %v709_v0 }
  0x60   :  { %503 = vmatpush3.bf16.msra.mxu0 %v566_v9  ;;  %523 = vmatpush3.bf16.msra.mxu1 %v574_v15 }
  0x61   :  { %504 = vmatprep.subr.bf16.mxu0 %v709_v0  ;;  %524 = vmatprep.subr.bf16.mxu1 %v709_v0 }
  0x64   :  { %505 = vmatpush3.bf16.msra.mxu0 %v567_v11  ;;  %525 = vmatpush3.bf16.msra.mxu1 %v575_v17 }
  0x65   :  { %506 = vmatprep.subr.bf16.mxu0 %v709_v0  ;;  %526 = vmatprep.subr.bf16.mxu1 %v709_v0 }
  0x68   :  { %507 = vmatpush3.bf16.msra.mxu0 %v568_v13  ;;  %527 = vmatpush3.bf16.msra.mxu1 %v576_v18 }
  0x69   :  { %532 = vmatprep.subr.bf16.mxu0 %v709_v0 }
  0x6b   :  { %509 = vmatmul.mubr.bf16.vlgmr.msra.gmra.mrb[0].mxu0 %v99_v16 }
  0x6c   :  { %548 = vmatprep.mubr.msk.bf16.mxu0 %vm710_vm0, %v709_v0  ;;  %533 = vmatpush3.bf16.msra.mxu0 %v577_v19 }
  0x6d   :  { %534 = vmatprep.subr.bf16.mxu0 %v709_v0 }
  0x70   :  { %535 = vmatpush3.bf16.msra.mxu0 %v578_v20 }
  0x71   :  { %536 = vmatprep.subr.bf16.mxu0 %v709_v0 }
  0x74   :  { %537 = vmatpush3.bf16.msra.mxu0 %v579_v21 }
  0x75   :  { %538 = vmatprep.subr.bf16.mxu0 %v709_v0 }
  0x78   :  { %539 = vmatpush3.bf16.msra.mxu0 %v580_v22 }
  0x79   :  { %540 = vmatprep.subr.bf16.mxu0 %v709_v0 }
  0x7c   :  { %541 = vmatpush3.bf16.msra.mxu0 %v581_v23 }
  0x7d   :  { %542 = vmatprep.subr.bf16.mxu0 %v709_v0 }
  0x80   :  { %543 = vmatpush3.bf16.msra.mxu0 %v582_v24 }
  0x81   :  { %544 = vmatprep.subr.bf16.mxu0 %v709_v0 }
  0x84   :  { %545 = vmatpush3.bf16.msra.mxu0 %v583_v33 }
  0x85   :  { %546 = vmatprep.subr.bf16.mxu0 %v709_v0 }
  0x88   :  { %547 = vmatpush3.bf16.msra.mxu0 %v584_v34 }
 0x13e   :  { %v188_v26 = vpop.f32.mrb[0].mxu0 }
 0x13f   :  { %v189_v27 = vadd.f32 %v438_v25, %v188_v26  ;;  %v510_v28 = vpop.f32.mrb[1].mxu0 }
 0x140   :  { %v191_v29 = vpop.f32.mrb[2].mxu0 }
 0x141   :  { %v194_v30 = vmax.f32 %v189_v27, 0.0  ;;  %v511_v31 = vpop.f32.mrb[3].mxu0 }
 0x143   :  { %v212_v32 = vpack.c.bf16 %v194_v30, %v194_v30 }
 0x145   :  { %529 = vmatmul.mubr.bf16.vlgmr.msra.gmra.mrb[0].mxu1 %v212_v32 }
 0x218   :  { %v301_v36 = vpop.f32.mrb[0].mxu1 }
 0x219   :  { %v302_v37 = vadd.f32 %v447_v35, %v301_v36  ;;  %v530_v38 = vpop.f32.mrb[1].mxu1 }
 0x21a   :  { %v304_v39 = vpop.f32.mrb[2].mxu1 }
 0x21b   :  { %v307_v40 = vmax.f32 %v302_v37, 0.0  ;;  %v531_v41 = vpop.f32.mrb[3].mxu1 }
 0x21d   :  { %v325_v42 = vpack.c.bf16 %v307_v40, %v307_v40 }
 0x21f   :  { %549 = vmatmul.mubr.bf16.vlgmr.msra.gmra.mrb[4].mxu0 %v325_v42 }
 0x2f2   :  { %v414_v44 = vpop.f32.mrb[4].mxu0 }
 0x2f3   :  { %v415_v45 = vadd.f32 %v456_v43, %v414_v44  ;;  %v550_v46 = vpop.f32.mrb[5].mxu0 }
 0x2f4   :  { %v417_v47 = vpop.f32.mrb[6].mxu0 }
 0x2f5   :  { %420 = vst [vmem:[#allocation10] sm:$0xff] %v415_v45  ;;  %v551_v48 = vpop.f32.mrb[7].mxu0 }
 0x2f6   :  { %684 = shalt.err (!%p681_p8)
}
 0x2f7   :  { %s685_s6 = scalar_lea.hbm %s867_s7, 128 }
 0x2f8   :  { %p686_p9 = scmp.ne.s32.totalorder %s867_s7, %s685_s6  ;;  %p689_p10 = scmp.lt.u32.totalorder %s685_s6, %s867_s7 }
 0x2fa   :  { %p691_p11 = pnand %p689_p10, %p686_p9 }
 0x2fc   :  { %694 = shalt.err (!%p691_p11)
}
 0x2fd   :  { %430 = dma.vmem_to_hbm [thread:$0]  %s428_s29, 128, %s867_s7, [#allocation4]  }
 0x2fe   :  { %701 = dma.done.wait [#allocation4], 128  }
 0x2ff   :  { %702 = vsyncadd [#allocation4], 4294967168 }
 0x300   :  { %434 = vsyncpa [#allocation3], 1 }
 0x301   :  { %435 = vsyncpa [#allocation6], 1 }
 0x302   :  { %436 = vsyncpa [#allocation9], 1 }
 0x303   :  { %437 = vsyncpa [#allocation4], 1 }

</bundles_post_ra>
